<compile_context>
chip_gen: v7x
topology: tpu7x:2x2x1
jax: 0.10.0
libtpu: 0.0.40
codegen_flags: <defaults>
</compile_context>

<pallas_src>
import jax
import jax.numpy as jnp
from jax.experimental import pallas as pl
from jax.experimental.pallas import tpu as pltpu


# --------------------------------------------------------------------------
# Kernel A: folded 1x1 projections (f, g^T, h) in bf16, tiled along HW
# --------------------------------------------------------------------------
def _proj_kernel(fc_ref, fs_ref, wc1_ref, bc1_ref, ws1t_ref, bs1_ref,
                 ws2_ref, bs2_ref, f_ref, gt_ref, h_ref):
    # fc/fs tiles: (C, thw); wc1/ws1t/ws2: (C, C) bf16 (per-batch, norm-folded)
    # bc1/bs2: (C, 1) f32; bs1: (1, C) f32.
    xc = fc_ref[...].astype(jnp.bfloat16)                    # (C, thw)
    xs = fs_ref[...].astype(jnp.bfloat16)                    # (C, thw)

    # f = Wc1' @ fc + bc1'      (== conv_c1(channel_norm(f_c)))
    f = jnp.dot(wc1_ref[...], xc,
                preferred_element_type=jnp.float32) + bc1_ref[...]
    # h = Ws2' @ fs + bs2'
    h = jnp.dot(ws2_ref[...], xs,
                preferred_element_type=jnp.float32) + bs2_ref[...]
    # g emitted transposed, (thw, C): g_t[j, o] = sum_i fs[i, j] * Ws1'[o, i].
    # Transpose is folded into the matmul orientation here (once per element)
    # so the attention kernel never transposes in its hot loop.
    g_t = jax.lax.dot_general(
        xs, ws1t_ref[...], (((0,), (0,)), ((), ())),
        preferred_element_type=jnp.float32) + bs1_ref[...]   # (thw, C)

    f_ref[...] = f.astype(f_ref.dtype)
    h_ref[...] = h.astype(h_ref.dtype)
    gt_ref[...] = g_t.astype(gt_ref.dtype)


# --------------------------------------------------------------------------
# Kernel B: flash attention + conv_csc + residual (all matmuls MXU-natural)
# --------------------------------------------------------------------------
def _attn_csc_kernel(f_ref, gt_ref, h_ref, fc_ref, wcsc_ref, bcsc_ref,
                     out_ref, m_ref, l_ref, acc_ref):
    # f/fc/out tiles: (C, tq); gt tile: (tk, C); h tile: (C, tk)
    # scratch: m, l (1, tq) f32; acc (C, tq) f32 (persistent across k axis).
    k = pl.program_id(2)

    @pl.when(k == 0)
    def _init():
        m_ref[...] = jnp.full(m_ref.shape, -jnp.inf, m_ref.dtype)
        l_ref[...] = jnp.zeros(l_ref.shape, l_ref.dtype)
        acc_ref[...] = jnp.zeros(acc_ref.shape, acc_ref.dtype)

    f_t = f_ref[...]            # (C, tq)  bf16
    g_t = gt_ref[...]           # (tk, C)  bf16
    h_t = h_ref[...]            # (C, tk)  bf16

    # scores_t[j, i] = sum_c g[c, j] * f[c, i]   -> key-major, natural matmul
    scores = jax.lax.dot_general(
        g_t, f_t, (((1,), (0,)), ((), ())),
        preferred_element_type=jnp.float32)                  # (tk, tq) f32

    # Online softmax over the key (sublane) axis; stats stay lane-oriented.
    m_prev = m_ref[...]                                      # (1, tq)
    m_new = jnp.maximum(m_prev, jnp.max(scores, axis=0, keepdims=True))
    alpha = jnp.exp(m_prev - m_new)                          # (1, tq)
    # TODO(synk): on v6e/v7x with C < 128 a bf16 exp would relieve the EUP;
    # kept f32 here (v5e EUP has no bf16 and C=512 is MXU-bound anyway).
    p = jnp.exp(scores - m_new)                              # (tk, tq) f32
    l_ref[...] = alpha * l_ref[...] + jnp.sum(p, axis=0, keepdims=True)

    # acc[c, i] += sum_j h[c, j] * p[j, i]   -> natural matmul, (C, tq) acc
    pv = jax.lax.dot_general(
        h_t, p.astype(h_t.dtype), (((1,), (0,)), ((), ())),
        preferred_element_type=jnp.float32)                  # (C, tq)
    acc_ref[...] = alpha * acc_ref[...] + pv
    m_ref[...] = m_new

    @pl.when(k == pl.num_programs(2) - 1)
    def _finalize():
        # Exact deferred softmax normalization (once per q tile -> free).
        o = acc_ref[...] * pl.reciprocal(l_ref[...], approx=False)  # (C, tq)
        # conv_csc: (C, C) @ (C, tq) -- natural -- fused with residual add.
        csc = jnp.dot(wcsc_ref[...], o, preferred_element_type=jnp.float32)
        res = csc + bcsc_ref[...] + fc_ref[...].astype(jnp.float32)
        out_ref[...] = res.astype(out_ref.dtype)


# --------------------------------------------------------------------------
# Wrapper
# --------------------------------------------------------------------------
def _pick_tile(hw, target):
    # Largest multiple of 128 that divides hw and is <= target; full hw if the
    # spatial size is small or not a multiple of 128.
    if hw <= 128 or hw % 128 != 0:
        return hw
    t = min(target, hw)
    t -= t % 128
    while hw % t:
        t -= 128
    return t


def _vmem_budget_bytes():
    cap = 128 << 20
    try:
        cap = int(pltpu.get_tpu_info().vmem_capacity_bytes)
    except Exception:
        pass
    # Leave headroom under the physical capacity (v7x: 64 MiB -> ~56 MiB);
    # never ask for more than ~100 MiB even on 128 MiB parts.
    return max(16 << 20, min(cap - (8 << 20), 100 << 20))


def sanet_forward(f_c, f_s, params, *, eps=1e-5, tq=None, tk=None, thw=None):
    assert f_c.shape == f_s.shape
    B, C, H, W = f_c.shape
    HW = H * W
    in_b = f_c.dtype.itemsize

    fc2 = f_c.reshape(B, C, HW)
    fs2 = f_s.reshape(B, C, HW)

    budget = _vmem_budget_bytes()
    small_vmem = budget < (72 << 20)          # v7x-class (64 MiB physical)

    # ---- channel-norm stats (tiny XLA reduction), folded into the weights ---
    def _stats(x):
        x32 = x.astype(jnp.float32)
        mean = jnp.mean(x32, axis=-1, keepdims=True)                  # (B,C,1)
        var = jnp.sum((x32 - mean) ** 2, axis=-1, keepdims=True) / (HW - 1)
        return mean, jax.lax.rsqrt(var + eps)

    mean_c, inv_c = _stats(fc2)
    mean_s, inv_s = _stats(fs2)

    wc1, bc1 = params["wc1"], params["bc1"]
    ws1, bs1 = params["ws1"], params["bs1"]
    ws2, bs2 = params["ws2"], params["bs2"]

    # W' = W * diag(invstd),  b' = b - W' @ mean   (per batch, f32 fold)
    wc1p = wc1[None] * jnp.swapaxes(inv_c, 1, 2)                      # (B,C,C)
    bc1p = bc1[None] - wc1p @ mean_c                                  # (B,C,1)
    ws2p = ws2[None] * jnp.swapaxes(inv_s, 1, 2)                      # (B,C,C)
    bs2p = bs2[None] - ws2p @ mean_s                                  # (B,C,1)
    ws1tp = ws1.T[None] * inv_s                                       # (B,C,C) (transposed fold)
    bs1p = jnp.swapaxes(bs1, 0, 1)[None] - jnp.swapaxes(mean_s, 1, 2) @ ws1tp  # (B,1,C)

    wc1p = wc1p.astype(jnp.bfloat16)
    ws2p = ws2p.astype(jnp.bfloat16)
    ws1tp = ws1tp.astype(jnp.bfloat16)

    # ---------------- Kernel A: tiled folded projections --------------------
    if thw is None:
        thw = _pick_tile(HW, 512 if small_vmem else 1024)
    assert HW % thw == 0
    n_hw = HW // thw

    slab_in = pl.BlockSpec((None, C, thw), lambda b, j: (b, 0, j))
    w_spec = pl.BlockSpec((None, C, C), lambda b, j: (b, 0, 0))
    bcol_spec = pl.BlockSpec((None, C, 1), lambda b, j: (b, 0, 0))
    brow_spec = pl.BlockSpec((None, 1, C), lambda b, j: (b, 0, 0))

    f_p, g_t, h_p = pl.pallas_call(
        _proj_kernel,
        out_shape=(jax.ShapeDtypeStruct((B, C, HW), jnp.bfloat16),   # f
                   jax.ShapeDtypeStruct((B, HW, C), jnp.bfloat16),   # g^T
                   jax.ShapeDtypeStruct((B, C, HW), jnp.bfloat16)),  # h
        grid=(B, n_hw),
        in_specs=[slab_in, slab_in,
                  w_spec, bcol_spec,        # Wc1', bc1'
                  w_spec, brow_spec,        # Ws1'^T, bs1'
                  w_spec, bcol_spec],       # Ws2', bs2'
        out_specs=(slab_in,
                   pl.BlockSpec((None, thw, C), lambda b, j: (b, j, 0)),
                   slab_in),
        compiler_params=pltpu.CompilerParams(
            dimension_semantics=("parallel", "parallel"),
            vmem_limit_bytes=budget),
        cost_estimate=pl.CostEstimate(
            flops=6 * B * C * C * HW,
            transcendentals=0,
            bytes_accessed=int(B * C * HW * (2 * in_b + 3 * 2)
                               + 3 * B * C * C * 2)),
    )(fc2, fs2, wc1p, bc1p, ws1tp, bs1p, ws2p, bs2p)

    # ---------------- Kernel B: flash attention + csc + residual ------------
    if tq is None:
        tq = _pick_tile(HW, 512 if small_vmem else 1024)
    if tk is None:
        tk = _pick_tile(HW, 1024 if small_vmem else 2048)
    assert HW % tq == 0 and HW % tk == 0

    def _attn_bytes(tq_, tk_):
        io = (C * tq_ * 2 + tk_ * C * 2 + C * tk_ * 2        # f, g^T, h (bf16)
              + 2 * C * tq_ * in_b)                          # fc residual + out
        scratch = (2 * tq_ + C * tq_) * 4
        temps = 3 * tq_ * tk_ * 4 + C * tq_ * 4
        return 2 * io + C * C * 4 + C * 4 + scratch + temps

    # Shrink tiles (keeping 128-alignment & divisibility) if over the budget.
    while _attn_bytes(tq, tk) > budget and tk % 256 == 0:
        tk //= 2
    while _attn_bytes(tq, tk) > budget and tq % 256 == 0:
        tq //= 2
    n_q, n_k = HW // tq, HW // tk

    fq_spec = pl.BlockSpec((None, C, tq), lambda b, qi, ki: (b, 0, qi))
    gt_spec = pl.BlockSpec((None, tk, C), lambda b, qi, ki: (b, ki, 0))
    hk_spec = pl.BlockSpec((None, C, tk), lambda b, qi, ki: (b, 0, ki))
    # NOTE: if profiling still shows the g/h DMA exposed at large tq, add
    # pipeline_mode=pl.Buffered(3) to gt_spec / hk_spec.

    cost = pl.CostEstimate(
        flops=4 * B * C * HW * HW + 2 * B * C * C * HW,
        transcendentals=B * HW * HW,
        bytes_accessed=int(2 * B * C * HW * in_b            # fc read + out write
                           + B * C * HW * 2                 # f read once
                           + n_q * 2 * B * C * HW * 2))     # g^T, h re-read per q tile

    out = pl.pallas_call(
        _attn_csc_kernel,
        out_shape=jax.ShapeDtypeStruct((B, C, HW), f_c.dtype),
        grid=(B, n_q, n_k),
        in_specs=[fq_spec, gt_spec, hk_spec, fq_spec,
                  pl.BlockSpec((C, C), lambda b, qi, ki: (0, 0)),
                  pl.BlockSpec((C, 1), lambda b, qi, ki: (0, 0))],
        out_specs=fq_spec,
        scratch_shapes=[pltpu.VMEM((1, tq), jnp.float32),    # running max
                        pltpu.VMEM((1, tq), jnp.float32),    # running denom
                        pltpu.VMEM((C, tq), jnp.float32)],   # output accumulator
        compiler_params=pltpu.CompilerParams(
            dimension_semantics=("parallel", "parallel", "arbitrary"),
            vmem_limit_bytes=budget),
        cost_estimate=cost,
    )(f_p, g_t, h_p, fc2, params["wcsc"], params["bcsc"])

    return out.reshape(B, C, H, W)


# --------------------------------------------------------------------------
# Pure-JAX reference (mirrors the PyTorch module, f32)
# --------------------------------------------------------------------------
def sanet_reference(f_c, f_s, params, eps=1e-5):
    B, C, H, W = f_c.shape
    HW = H * W

    def cn(x):
        m = jnp.mean(x, axis=(-1, -2), keepdims=True)
        v = jnp.var(x, axis=(-1, -2), keepdims=True, ddof=1)
        return (x - m) / jnp.sqrt(v + eps)

    def conv1x1(x, w, b):
        return jnp.einsum('oc,bchw->bohw', w, x) + b.reshape(1, C, 1, 1)

    fch, fsh = cn(f_c), cn(f_s)
    f = conv1x1(fch, params["wc1"], params["bc1"]).reshape(B, C, HW)
    g = conv1x1(fsh, params["ws1"], params["bs1"]).reshape(B, C, HW)
    attn = jax.nn.softmax(jnp.einsum('bci,bcj->bij', f, g), axis=-1)  # (B,HW,HW)
    h = conv1x1(fsh, params["ws2"], params["bs2"]).reshape(B, C, HW)
    out = jnp.einsum('bcj,bij->bci', h, attn).reshape(B, C, H, W)
    return conv1x1(out, params["wcsc"], params["bcsc"]) + f_c


def init_params(key, C):
    ks = jax.random.split(key, 8)
    bound = 1.0 / jnp.sqrt(C)  # matches nn.Conv2d default init (fan_in = C*1*1)
    def u(k, shape):
        return jax.random.uniform(k, shape, jnp.float32, -bound, bound)
    return {
        "wc1": u(ks[0], (C, C)),  "bc1": u(ks[1], (C, 1)),
        "ws1": u(ks[2], (C, C)),  "bs1": u(ks[3], (C, 1)),
        "ws2": u(ks[4], (C, C)),  "bs2": u(ks[5], (C, 1)),
        "wcsc": u(ks[6], (C, C)), "bcsc": u(ks[7], (C, 1)),
    }


if __name__ == "__main__":
    key = jax.random.PRNGKey(0)
    k_fc, k_fs, k_p = jax.random.split(key, 3)

    B, C, H, W = 2, 4, 16, 16
    f_c = jax.random.normal(k_fc, (B, C, H, W), jnp.float32)
    f_s = jax.random.normal(k_fs, (B, C, H, W), jnp.float32)
    params = init_params(k_p, C)

    # thw=128 exercises the HW-tiled projection pass; tq=tk=128 exercises the
    # multi-step online softmax (grid (B, 2, 2)).
    out = sanet_forward(f_c, f_s, params, thw=128, tq=128, tk=128)
    out = jax.block_until_ready(out)

    ref = jax.block_until_ready(sanet_reference(f_c, f_s, params))
    assert out.shape == (B, C, H, W)
    # bf16 MXU operands -> compare against the f32 reference loosely.
    err = float(jnp.max(jnp.abs(out - ref)))
    assert err < 5e-2, f"max abs err {err}"

    print("KERNEL_OK")
</pallas_src>

<mosaic_0001>
module attributes {stable_mosaic.version = 11 : i64} {
  func.func @_proj_kernel(%arg0: i32, %arg1: i32, %arg2: memref<1x4x128xf32, #tpu.memory_space<vmem>>, %arg3: memref<1x4x128xf32, #tpu.memory_space<vmem>>, %arg4: memref<1x4x4xbf16, #tpu.memory_space<vmem>>, %arg5: memref<1x4x1xf32, #tpu.memory_space<vmem>>, %arg6: memref<1x4x4xbf16, #tpu.memory_space<vmem>>, %arg7: memref<1x1x4xf32, #tpu.memory_space<vmem>>, %arg8: memref<1x4x4xbf16, #tpu.memory_space<vmem>>, %arg9: memref<1x4x1xf32, #tpu.memory_space<vmem>>, %arg10: memref<1x4x128xbf16, #tpu.memory_space<vmem>>, %arg11: memref<1x128x4xbf16, #tpu.memory_space<vmem>>, %arg12: memref<1x4x128xbf16, #tpu.memory_space<vmem>>) attributes {dimension_semantics = [#tpu.dimension_semantics<parallel>, #tpu.dimension_semantics<parallel>], iteration_bounds = array<i64: 2, 2>, scalar_prefetch = 0 : i64, scratch_operands = 0 : i64, tpu.core_type = #tpu.core_type<tc>, window_params = [{transform_indices = @transform_0, window_bounds = array<i64: 1, 4, 128>}, {transform_indices = @transform_1, window_bounds = array<i64: 1, 4, 128>}, {transform_indices = @transform_2, window_bounds = array<i64: 1, 4, 4>}, {transform_indices = @transform_3, window_bounds = array<i64: 1, 4, 1>}, {transform_indices = @transform_4, window_bounds = array<i64: 1, 4, 4>}, {transform_indices = @transform_5, window_bounds = array<i64: 1, 1, 4>}, {transform_indices = @transform_6, window_bounds = array<i64: 1, 4, 4>}, {transform_indices = @transform_7, window_bounds = array<i64: 1, 4, 1>}, {transform_indices = @transform_8, window_bounds = array<i64: 1, 4, 128>}, {transform_indices = @transform_9, window_bounds = array<i64: 1, 128, 4>}, {transform_indices = @transform_10, window_bounds = array<i64: 1, 4, 128>}]} {
    %c0 = arith.constant 0 : index
    %c0_0 = arith.constant 0 : index
    %c0_1 = arith.constant 0 : index
    %0 = vector.load %arg2[%c0, %c0_0, %c0_1] : memref<1x4x128xf32, #tpu.memory_space<vmem>>, vector<1x4x128xf32>
    %1 = vector.shape_cast %0 : vector<1x4x128xf32> to vector<4x128xf32>
    %2 = arith.truncf %1 : vector<4x128xf32> to vector<4x128xbf16>
    %c0_2 = arith.constant 0 : index
    %c0_3 = arith.constant 0 : index
    %c0_4 = arith.constant 0 : index
    %3 = vector.load %arg3[%c0_2, %c0_3, %c0_4] : memref<1x4x128xf32, #tpu.memory_space<vmem>>, vector<1x4x128xf32>
    %4 = vector.shape_cast %3 : vector<1x4x128xf32> to vector<4x128xf32>
    %5 = arith.truncf %4 : vector<4x128xf32> to vector<4x128xbf16>
    %c0_5 = arith.constant 0 : index
    %c0_6 = arith.constant 0 : index
    %c0_7 = arith.constant 0 : index
    %6 = vector.load %arg4[%c0_5, %c0_6, %c0_7] : memref<1x4x4xbf16, #tpu.memory_space<vmem>>, vector<1x4x4xbf16>
    %7 = vector.shape_cast %6 : vector<1x4x4xbf16> to vector<4x4xbf16>
    %cst = arith.constant dense<0.000000e+00> : vector<4x128xf32>
    %8 = tpu.matmul %7, %2, %cst {dimension_numbers = #tpu.dot_dimension_numbers<[1], [0], [0], [1], [0, 0, 1, 1], [], []>} : vector<4x4xbf16>, vector<4x128xbf16>, vector<4x128xf32> -> vector<4x128xf32>
    %c0_8 = arith.constant 0 : index
    %c0_9 = arith.constant 0 : index
    %c0_10 = arith.constant 0 : index
    %9 = vector.load %arg5[%c0_8, %c0_9, %c0_10] : memref<1x4x1xf32, #tpu.memory_space<vmem>>, vector<1x4x1xf32>
    %10 = vector.shape_cast %9 : vector<1x4x1xf32> to vector<4x1xf32>
    %11 = vector.broadcast %10 : vector<4x1xf32> to vector<4x128xf32>
    %12 = arith.addf %8, %11 : vector<4x128xf32>
    %c0_11 = arith.constant 0 : index
    %c0_12 = arith.constant 0 : index
    %c0_13 = arith.constant 0 : index
    %13 = vector.load %arg8[%c0_11, %c0_12, %c0_13] : memref<1x4x4xbf16, #tpu.memory_space<vmem>>, vector<1x4x4xbf16>
    %14 = vector.shape_cast %13 : vector<1x4x4xbf16> to vector<4x4xbf16>
    %cst_14 = arith.constant dense<0.000000e+00> : vector<4x128xf32>
    %15 = tpu.matmul %14, %5, %cst_14 {dimension_numbers = #tpu.dot_dimension_numbers<[1], [0], [0], [1], [0, 0, 1, 1], [], []>} : vector<4x4xbf16>, vector<4x128xbf16>, vector<4x128xf32> -> vector<4x128xf32>
    %c0_15 = arith.constant 0 : index
    %c0_16 = arith.constant 0 : index
    %c0_17 = arith.constant 0 : index
    %16 = vector.load %arg9[%c0_15, %c0_16, %c0_17] : memref<1x4x1xf32, #tpu.memory_space<vmem>>, vector<1x4x1xf32>
    %17 = vector.shape_cast %16 : vector<1x4x1xf32> to vector<4x1xf32>
    %18 = vector.broadcast %17 : vector<4x1xf32> to vector<4x128xf32>
    %19 = arith.addf %15, %18 : vector<4x128xf32>
    %c0_18 = arith.constant 0 : index
    %c0_19 = arith.constant 0 : index
    %c0_20 = arith.constant 0 : index
    %20 = vector.load %arg6[%c0_18, %c0_19, %c0_20] : memref<1x4x4xbf16, #tpu.memory_space<vmem>>, vector<1x4x4xbf16>
    %21 = vector.shape_cast %20 : vector<1x4x4xbf16> to vector<4x4xbf16>
    %cst_21 = arith.constant dense<0.000000e+00> : vector<128x4xf32>
    %22 = tpu.matmul %5, %21, %cst_21 {dimension_numbers = #tpu.dot_dimension_numbers<[0], [0], [1], [1], [0, 1, 1, 1], [], []>} : vector<4x128xbf16>, vector<4x4xbf16>, vector<128x4xf32> -> vector<128x4xf32>
    %c0_22 = arith.constant 0 : index
    %c0_23 = arith.constant 0 : index
    %c0_24 = arith.constant 0 : index
    %23 = vector.load %arg7[%c0_22, %c0_23, %c0_24] : memref<1x1x4xf32, #tpu.memory_space<vmem>>, vector<1x1x4xf32>
    %24 = vector.shape_cast %23 : vector<1x1x4xf32> to vector<1x4xf32>
    %25 = vector.broadcast %24 : vector<1x4xf32> to vector<128x4xf32>
    %26 = arith.addf %22, %25 : vector<128x4xf32>
    %27 = arith.truncf %12 : vector<4x128xf32> to vector<4x128xbf16>
    %c0_25 = arith.constant 0 : index
    %c0_26 = arith.constant 0 : index
    %c0_27 = arith.constant 0 : index
    %28 = vector.load %arg10[%c0_25, %c0_26, %c0_27] : memref<1x4x128xbf16, #tpu.memory_space<vmem>>, vector<1x4x128xbf16>
    %29 = vector.shape_cast %28 : vector<1x4x128xbf16> to vector<4x128xbf16>
    %30 = vector.shape_cast %27 : vector<4x128xbf16> to vector<1x4x128xbf16>
    tpu.vector_store %arg10[%c0_25, %c0_26, %c0_27], %30 {strides = array<i32>} : memref<1x4x128xbf16, #tpu.memory_space<vmem>>, vector<1x4x128xbf16>,
    %31 = arith.truncf %19 : vector<4x128xf32> to vector<4x128xbf16>
    %c0_28 = arith.constant 0 : index
    %c0_29 = arith.constant 0 : index
    %c0_30 = arith.constant 0 : index
    %32 = vector.load %arg12[%c0_28, %c0_29, %c0_30] : memref<1x4x128xbf16, #tpu.memory_space<vmem>>, vector<1x4x128xbf16>
    %33 = vector.shape_cast %32 : vector<1x4x128xbf16> to vector<4x128xbf16>
    %34 = vector.shape_cast %31 : vector<4x128xbf16> to vector<1x4x128xbf16>
    tpu.vector_store %arg12[%c0_28, %c0_29, %c0_30], %34 {strides = array<i32>} : memref<1x4x128xbf16, #tpu.memory_space<vmem>>, vector<1x4x128xbf16>,
    %35 = arith.truncf %26 : vector<128x4xf32> to vector<128x4xbf16>
    %c0_31 = arith.constant 0 : index
    %c0_32 = arith.constant 0 : index
    %c0_33 = arith.constant 0 : index
    %36 = vector.load %arg11[%c0_31, %c0_32, %c0_33] : memref<1x128x4xbf16, #tpu.memory_space<vmem>>, vector<1x128x4xbf16>
    %37 = vector.shape_cast %36 : vector<1x128x4xbf16> to vector<128x4xbf16>
    %38 = vector.shape_cast %35 : vector<128x4xbf16> to vector<1x128x4xbf16>
    tpu.vector_store %arg11[%c0_31, %c0_32, %c0_33], %38 {strides = array<i32>} : memref<1x128x4xbf16, #tpu.memory_space<vmem>>, vector<1x128x4xbf16>,
    return
  }
  func.func @transform_0(%arg0: i32, %arg1: i32) -> (i32, i32, i32) {
    %c0_i32 = arith.constant 0 : i32
    %c0_i32_0 = arith.constant 0 : i32
    return %arg0, %c0_i32, %arg1 : i32, i32, i32
  }
  func.func @transform_1(%arg0: i32, %arg1: i32) -> (i32, i32, i32) {
    %c0_i32 = arith.constant 0 : i32
    %c0_i32_0 = arith.constant 0 : i32
    return %arg0, %c0_i32, %arg1 : i32, i32, i32
  }
  func.func @transform_2(%arg0: i32, %arg1: i32) -> (i32, i32, i32) {
    %c0_i32 = arith.constant 0 : i32
    %c0_i32_0 = arith.constant 0 : i32
    %c0_i32_1 = arith.constant 0 : i32
    return %arg0, %c0_i32, %c0_i32_0 : i32, i32, i32
  }
  func.func @transform_3(%arg0: i32, %arg1: i32) -> (i32, i32, i32) {
    %c0_i32 = arith.constant 0 : i32
    %c0_i32_0 = arith.constant 0 : i32
    %c0_i32_1 = arith.constant 0 : i32
    return %arg0, %c0_i32, %c0_i32_0 : i32, i32, i32
  }
  func.func @transform_4(%arg0: i32, %arg1: i32) -> (i32, i32, i32) {
    %c0_i32 = arith.constant 0 : i32
    %c0_i32_0 = arith.constant 0 : i32
    %c0_i32_1 = arith.constant 0 : i32
    return %arg0, %c0_i32, %c0_i32_0 : i32, i32, i32
  }
  func.func @transform_5(%arg0: i32, %arg1: i32) -> (i32, i32, i32) {
    %c0_i32 = arith.constant 0 : i32
    %c0_i32_0 = arith.constant 0 : i32
    %c0_i32_1 = arith.constant 0 : i32
    return %arg0, %c0_i32, %c0_i32_0 : i32, i32, i32
  }
  func.func @transform_6(%arg0: i32, %arg1: i32) -> (i32, i32, i32) {
    %c0_i32 = arith.constant 0 : i32
    %c0_i32_0 = arith.constant 0 : i32
    %c0_i32_1 = arith.constant 0 : i32
    return %arg0, %c0_i32, %c0_i32_0 : i32, i32, i32
  }
  func.func @transform_7(%arg0: i32, %arg1: i32) -> (i32, i32, i32) {
    %c0_i32 = arith.constant 0 : i32
    %c0_i32_0 = arith.constant 0 : i32
    %c0_i32_1 = arith.constant 0 : i32
    return %arg0, %c0_i32, %c0_i32_0 : i32, i32, i32
  }
  func.func @transform_8(%arg0: i32, %arg1: i32) -> (i32, i32, i32) {
    %c0_i32 = arith.constant 0 : i32
    %c0_i32_0 = arith.constant 0 : i32
    return %arg0, %c0_i32, %arg1 : i32, i32, i32
  }
  func.func @transform_9(%arg0: i32, %arg1: i32) -> (i32, i32, i32) {
    %c0_i32 = arith.constant 0 : i32
    %c0_i32_0 = arith.constant 0 : i32
    return %arg0, %arg1, %c0_i32 : i32, i32, i32
  }
  func.func @transform_10(%arg0: i32, %arg1: i32) -> (i32, i32, i32) {
    %c0_i32 = arith.constant 0 : i32
    %c0_i32_0 = arith.constant 0 : i32
    return %arg0, %c0_i32, %arg1 : i32, i32, i32
  }
}

</mosaic_0001>

<bundles_post_ra>
// kernel: tpu_custom_call.1
= control target key start
LH: loop header
LB: loop body
LE: loop exit
PB: predicated region body
PF: predicated region fallthrough
CT: control target
= control target key end

     0   :  { %s2851_s0 = inlined_call_operand.hbm [shape: f32[2,4,256], index: 0, kind: input, shape index: {}]   ;;  %s2852_s1 = inlined_call_operand.hbm [shape: f32[2,4,256], index: 1, kind: input, shape index: {}]   ;;  %s2853_s2 = inlined_call_operand.hbm [shape: bf16[2,4,4], index: 2, kind: input, shape index: {}]   ;;  %s2854_s3 = inlined_call_operand.hbm [shape: f32[2,4,1], index: 3, kind: input, shape index: {}]   ;;  %s2855_s4 = inlined_call_operand.hbm [shape: bf16[2,4,4], index: 4, kind: input, shape index: {}]   ;;  %s2856_s5 = inlined_call_operand.hbm [shape: f32[2,1,4], index: 5, kind: input, shape index: {}]   ;;  %s2857_s6 = inlined_call_operand.hbm [shape: bf16[2,4,4], index: 6, kind: input, shape index: {}]   ;;  %s2858_s7 = inlined_call_operand.hbm [shape: f32[2,4,1], index: 7, kind: input, shape index: {}]   ;;  %s2859_s8 = inlined_call_operand.hbm [shape: bf16[2,4,256], index: 8, kind: output, shape index: {0}]   ;;  %s2860_s9 = inlined_call_operand.hbm [shape: bf16[2,256,4], index: 9, kind: output, shape index: {1}]   ;;  %s2861_s10 = inlined_call_operand.hbm [shape: bf16[2,4,256], index: 10, kind: output, shape index: {2}]  }
   0x1   :  { %2896 = sst [smem:[#allocation42_spill]] %s2852_s1 }
   0x2   :  { %2897 = sst [smem:[#allocation43_spill]] %s2854_s3 }
   0x3   :  { %2898 = sst [smem:[#allocation44_spill]] %s2856_s5 }
   0x4   :  { %2899 = sst [smem:[#allocation45_spill]] %s2859_s8 }
   0x5   :  { %2900 = sst [smem:[#allocation46_spill]] %s2860_s9 }
   0x6   :  { %2901 = sst [smem:[#allocation47_spill]] %s2861_s10 }
   0x7   :  { %16 = vsyncpa [#allocation3], 0 }
   0x8   :  { %18 = vsyncpa [#allocation3 + $0x1], 0 }
   0x9   :  { %19 = vsyncpa [#allocation6], 0 }
   0xa   :  { %21 = vsyncpa [#allocation6 + $0x1], 0 }
   0xb   :  { %22 = vsyncpa [#allocation9], 0 }
   0xc   :  { %24 = vsyncpa [#allocation9 + $0x1], 0 }
   0xd   :  { %25 = vsyncpa [#allocation12], 0 }
   0xe   :  { %27 = vsyncpa [#allocation12 + $0x1], 0 }
   0xf   :  { %28 = vsyncpa [#allocation15], 0 }
  0x10   :  { %30 = vsyncpa [#allocation15 + $0x1], 0 }
  0x11   :  { %31 = vsyncpa [#allocation4], 0 }
  0x12   :  { %33 = vsyncpa [#allocation4 + $0x1], 0 }
  0x13   :  { %34 = vsyncpa [#allocation18], 0 }
  0x14   :  { %36 = vsyncpa [#allocation18 + $0x1], 0  ;;  %s2177_s13 = smov 0   ;;  %s2179_s14 = smov 0  }
  0x15   :  { %s2181_s15 = smov 0   ;;  %s2183_s16 = smov 0  }
  0x16   :  { %s2185_s17 = smov 0   ;;  %s2187_s18 = smov 0  }
  0x17   :  { %s2189_s19 = smov 0   ;;  %s2191_s20 = smov 0  }
  0x18   :  { %s2193_s21 = smov 0   ;;  %s2195_s22 = smov 0  }
  0x19   :  { %s2197_s23 = smov 0  }
  0x1a LB: > { %2902 = sst [smem:[#allocation28_spill]] %s2068_s14  ;;  %s2233_s24 = sadd.s32 4294967295, %s2104_s23   ;;  %s2104_s23 = sphi %s2197_s23, %s42_s23   ;;  %s2100_s22 = sphi %s2195_s22, %s2982_s22   ;;  %s2096_s21 = sphi %s2193_s21, %s2981_s21   ;;  %s2092_s20 = sphi %s2191_s20, %s2980_s20   ;;  %s2088_s19 = sphi %s2189_s19, %s2974_s19   ;;  %s2084_s18 = sphi %s2187_s18, %s2979_s18   ;;  %s2080_s17 = sphi %s2185_s17, %s2978_s17   ;;  %s2076_s16 = sphi %s2183_s16, %s2977_s16   ;;  %s2072_s15 = sphi %s2181_s15, %s2972_s15   ;;  %s2068_s14 = sphi %s2179_s14, %s2971_s14   ;;  %s2064_s13 = sphi %s2177_s13, %s2970_s13  }
  0x1b   : > { %2903 = sst [smem:[#allocation29_spill]] %s2072_s15  ;;  %s51_s26 = sadd.s32 1, %s2096_s21 }
  0x1c   : > { %2904 = sst [smem:[#allocation30_spill]] %s2076_s16  ;;  %s54_s27 = sadd.s32 1, %s2100_s22 }
  0x1d   : > { %2905 = sst [smem:[#allocation31_spill]] %s2088_s19  ;;  %p52_p0 = scmp.ge.s32.totalorder %s51_s26, 2 }
  0x1e   : > { %2906 = sst [smem:[#allocation32_spill]] %s2092_s20  ;;  %s63_s28 = sadd.s32 1, %s2084_s18 }
  0x1f   : > { %2907 = sst [smem:[#allocation33_spill]] %s2096_s21  ;;  %p70_p1 = scmp.ne.s32.totalorder %s2084_s18, %s2080_s17 }
  0x20   : > { %2908 = sst [smem:[#allocation34_spill]] %s2104_s23  ;;  %p71_p2 = scmp.eq.s32.totalorder %s2104_s23, 0 }
  0x21   : > { %s2984_s26 = smov (%p52_p0, %s51_s26), 0  ;;  %s2986_s27 = smov (!%p52_p0, %s54_s27), %s2100_s22 }
  0x22   : > { %2909 = sst [smem:[#allocation35_spill]] %s2984_s26  ;;  %s59_s29 = ssub.s32 %s2096_s21, %s2984_s26 }
  0x23   : > { %p2252_p3 = por %p71_p2, %p70_p1  ;;  %p56_p4 = scmp.ge.s32.totalorder %s2986_s27, 2 }
  0x24   : > { %p2867_p5 = scmp.ne.s32.totalorder %s2080_s17, %s2076_s16  ;;  %p77_p6 = scmp.eq.s32.totalorder %s2233_s24, 0 }
  0x25   : > { %s117_s11 = sadd.s32 1, %s2072_s15  ;;  %s2988_s27 = smov (%p56_p4, %s2986_s27), 0 }
  0x26   : > { %2911 = sst [smem:[#allocation36_spill]] %s2988_s27  ;;  %p2267_p7 = por %p77_p6, %p2867_p5 }
  0x27   : > { %p124_p8 = scmp.ne.s32.totalorder %s2072_s15, %s2068_s14  ;;  %s58_s25 = ssub.s32 %s2100_s22, %s2988_s27 }
  0x28   : > { %s2912_s12 = scalar_select %p2267_p7, 1, 0 }
  0x29   : > { %p130_p9 = scmp.ne.s32.totalorder %s2068_s14, %s2064_s13  ;;  %s60_s26 = sor.u32 %s59_s29, %s58_s25 }
  0x2a   : > { %p115_p10 = scmp.eq.s32.totalorder %s58_s25, 0  ;;  %p61_p11 = scmp.eq.s32.totalorder %s60_s26, 0 }
  0x2b   : > { %p2279_p12 = por %p124_p8, %p71_p2  ;;  %p2291_p13 = por %p130_p9, %p77_p6 }
  0x2c   : > { %s2284_s9 = scalar_select %p115_p10, %s2072_s15, %s117_s11  }
  0x2d   : > { %s2287_s8 = scalar_select %p61_p11, %s2084_s18, %s63_s28  }
  0x2e   : > { %2914 = sst [smem:[#allocation37_spill]] %s2284_s9  ;;  %p286_p0 = scmp.eq.s32.totalorder %s2233_s24, 3 }
  0x2f   : > { %2915 = sst [smem:[#allocation38_spill]] %s2287_s8  ;;  %s2918_s13 = sadd.s32 4294967294, %s2104_s23  }
  0x30   : > { %s2916_s27 = scalar_select %p2291_p13, 1, 0 }
  0x31   : > { %p292_p4 = scmp.eq.s32.totalorder %s2918_s13, 3  ;;  %p2301_p5 = por %p286_p0, %p70_p1 }
  0x32   : > { %2917 = sst [smem:[#allocation39_spill]] %s2916_s27  ;;  %p1565_p2 = scmp.lt.s32.totalorder %s2104_s23, 4 }
  0x33   : > { %s2919_s25 = scalar_select %p2301_p5, 1, 0 }
  0x34   : > { %p2921_p8 = scmp.ne.s32.totalorder %s2080_s17, %s2076_s16  ;;  %s2870_s28 = sand.u32 1, %s2084_s18  }
  0x35   : > { %2920 = sst [smem:[#allocation40_spill]] %s2919_s25  ;;  %s2316_s29 = sshll.u32 %s2870_s28, 2 }
  0x36   : > { %p2309_p10 = por %p292_p4, %p2921_p8  ;;  %s1379_s11 = sshll.u32 %s2100_s22, 1 }
  0x37   : > { %s2320_s8 = sadd.s32 %s2096_s21, %s1379_s11  ;;  %p2324_p1 = pnand %p1565_p2, %p2252_p3 }
  0x38   : > { %s2922_s26 = scalar_select %p2309_p10, 1, 0 }
  0x39   : > { %s2924_s13 = scalar_select %p2324_p1, 1, 0 }
  0x3a   : > { %2923 = sst [smem:[#allocation41_spill]] %s2922_s26  ;;  %s2876_s9 = sshll.u32 %s2320_s8, 6 }
  0x3b   : > { %s2330_s16 = sand.u32 1, %s2104_s23   ;;  %s2925_s1 = sld [smem:[#allocation42_spill]] }
  0x3c   : > { %s392_s30 = scalar_lea.vmem [#allocation5], %s2316_s29  ;;  %p2342_p3 = pnand %p1565_p2, %p2279_p12 }
  0x3d   : > { %s401_s11 = sshll.u32 %s392_s30, 4  ;;  %p2885_p11 = pneg %p2324_p1  ;;  %s2346_s11 = int_to_ptr.vmem [resolvable:$true] %s401_s11 }
  0x3e   : > { %s2926_s21 = scalar_select %p2342_p3, 1, 0 }
  0x41   : > { %s2337_s25 = scalar_lea.hbm %s2925_s1, %s2876_s9  ;;  %s1667_s10 = scalar_lea.hbm %s2925_s1, 256 }
  0x42   : > { %s1662_s20 = scalar_lea.hbm %s2337_s25, 64  ;;  %p1668_p12 = scmp.lt.u32.totalorder %s2337_s25, %s2925_s1 }
  0x43   : > { %p1663_p9 = scmp.ne.s32.totalorder %s2337_s25, %s1662_s20  ;;  %p1669_p2 = scmp.lt.u32.totalorder %s1667_s10, %s1662_s20 }
  0x44   : > { %p1671_p6 = scmp.lt.u32.totalorder %s1662_s20, %s2337_s25 }
  0x45   : > { %p1665_p0 = pnand %p2885_p11, %p1663_p9  ;;  %p1670_p8 = por %p1669_p2, %p1668_p12 }
  0x47   : > { %p1666_p4 = pneg %p1665_p0  ;;  %p1672_p10 = por %p1671_p6, %p1670_p8 }
  0x49   : > { %p1673_p5 = pnand %p1672_p10, %p1666_p4 }
  0x4b   : > { %1676 = shalt.err (!%p1673_p5)
}
  0x4c   : > { %s1677_s19 = scalar_lea.vmem %s2346_s11, 64  ;;  %s2106_s26 = smov [#allocation5]  }
  0x4d   : > { %p1678_p9 = scmp.ne.s32.totalorder %s2346_s11, %s1677_s19  ;;  %s1682_s28 = sshll.u32 %s2106_s26, 4  ;;  %s1683_s28 = int_to_ptr.vmem [resolvable:$false] %s1682_s28 }
  0x4e   : > { %s1684_s9 = scalar_lea.vmem %s1683_s28, 128  ;;  %p1685_p7 = scmp.lt.s32.totalorder %s2346_s11, %s1683_s28 }
  0x4f   : > { %p1680_p0 = pnand %p1678_p9, %p2885_p11  ;;  %p1686_p12 = scmp.lt.s32.totalorder %s1684_s9, %s1677_s19 }
  0x51   : > { %p1681_p13 = pneg %p1680_p0  ;;  %p1687_p2 = por %p1686_p12, %p1685_p7 }
  0x53   : > { %p1688_p6 = pnand %p1687_p2, %p1681_p13 }
  0x55   : > { %1691 = shalt.err (!%p1688_p6)
}
  0x56   : > { %s2927_s20 = scalar_lea.sflag [#allocation6], %s2330_s16  ;;  %p513_p5 = scmp.lt.s32.totalorder %s2104_s23, 5 }
  0x57   : > { %1536 = dma.hbm_to_vmem [thread:$0]  (!%p2324_p1), %s2337_s25, 64, %s2346_s11, %s2927_s20  }
  0x58   : > { %s2379_s10 = sand.u32 1, %s2072_s15   ;;  %p2928_p7 = scmp.ge.s32.totalorder %s2104_s23, 1 }
  0x59   : > { %s2884_s30 = sshll.u32 %s2379_s10, 2  ;;  %s2883_s26 = sshll.u32 %s2100_s22, 6 }
  0x5a   : > { %p2383_p13 = pnand %p2928_p7, %p513_p5  ;;  %s2930_s3 = sld [smem:[#allocation43_spill]] }
  0x5b   : > { %s430_s25 = scalar_lea.vmem [#allocation8], %s2884_s30  ;;  %p2405_p4 = pneg %p2342_p3 }
  0x5c   : > { %s2929_s19 = scalar_select %p2383_p13, 1, 0 }
  0x5d   : > { %s437_s11 = sshll.u32 %s430_s25, 4  ;;  %s2398_s11 = int_to_ptr.vmem [resolvable:$true] %s437_s11 }
  0x5e   : > { %s2931_s23 = scalar_select %p2405_p4, 1, 0 }
  0x60   : > { %s2394_s1 = scalar_lea.hbm %s2930_s3, %s2883_s26  ;;  %s1697_s26 = scalar_lea.hbm %s2930_s3, 128 }
  0x61   : > { %s1692_s15 = scalar_lea.hbm %s2394_s1, 64  ;;  %p1698_p0 = scmp.lt.u32.totalorder %s2394_s1, %s2930_s3 }
  0x62   : > { %p1693_p10 = scmp.ne.s32.totalorder %s2394_s1, %s1692_s15  ;;  %p1699_p12 = scmp.lt.u32.totalorder %s1697_s26, %s1692_s15 }
  0x63   : > { %p1701_p6 = scmp.lt.u32.totalorder %s1692_s15, %s2394_s1 }
  0x64   : > { %p1695_p8 = pnand %p2405_p4, %p1693_p10  ;;  %p1700_p2 = por %p1699_p12, %p1698_p0 }
  0x66   : > { %p1696_p9 = pneg %p1695_p8  ;;  %p1702_p5 = por %p1701_p6, %p1700_p2 }
  0x68   : > { %p1703_p7 = pnand %p1702_p5, %p1696_p9 }
  0x6a   : > { %1706 = shalt.err (!%p1703_p7)
}
  0x6b   : > { %s1707_s20 = scalar_lea.vmem %s2398_s11, 64  ;;  %s2107_s28 = smov [#allocation8]  }
  0x6c   : > { %p1708_p10 = scmp.ne.s32.totalorder %s2398_s11, %s1707_s20  ;;  %s1712_s9 = sshll.u32 %s2107_s28, 4  ;;  %s1713_s9 = int_to_ptr.vmem [resolvable:$false] %s1712_s9 }
  0x6d   : > { %s1714_s30 = scalar_lea.vmem %s1713_s9, 128  ;;  %p1715_p13 = scmp.lt.s32.totalorder %s2398_s11, %s1713_s9 }
  0x6e   : > { %p1710_p8 = pnand %p1708_p10, %p2405_p4  ;;  %p1716_p1 = scmp.lt.s32.totalorder %s1714_s30, %s1707_s20 }
  0x70   : > { %p1711_p11 = pneg %p1710_p8  ;;  %p1717_p0 = por %p1716_p1, %p1715_p13 }
  0x72   : > { %p1718_p12 = pnand %p1717_p0, %p1711_p11 }
  0x74   : > { %1721 = shalt.err (!%p1718_p12)
}
  0x75   : > { %s2932_s15 = scalar_lea.sflag [#allocation9], %s2330_s16  ;;  %s1390_s26 = sshll.u32 %s2100_s22, 4 }
  0x76   : > { %1542 = dma.hbm_to_vmem [thread:$0]  (!%p2342_p3), %s2394_s1, 64, %s2398_s11, %s2932_s15  }
  0x77   : > { %s2933_s5 = sld [smem:[#allocation44_spill]]  ;;  %s465_s20 = scalar_lea.vmem [#allocation11], %s2379_s10 }
  0x78   : > { %s472_s30 = sshll.u32 %s465_s20, 4  ;;  %s473_s30 = int_to_ptr.vmem [resolvable:$true] %s472_s30 }
  0x7d   : > { %s2434_s9 = scalar_lea.hbm %s2933_s5, %s1390_s26  ;;  %s1727_s15 = scalar_lea.hbm %s2933_s5, 32 }
  0x7e   : > { %s1722_s27 = scalar_lea.hbm %s2434_s9, 16  ;;  %p1728_p9 = scmp.lt.u32.totalorder %s2434_s9, %s2933_s5 }
  0x7f   : > { %p1723_p1 = scmp.ne.s32.totalorder %s2434_s9, %s1722_s27  ;;  %p1729_p2 = scmp.lt.u32.totalorder %s1727_s15, %s1722_s27 }
  0x80   : > { %p1731_p5 = scmp.lt.u32.totalorder %s1722_s27, %s2434_s9 }
  0x81   : > { %p1725_p11 = pnand %p1723_p1, %p2405_p4  ;;  %p1730_p6 = por %p1729_p2, %p1728_p9 }
  0x83   : > { %p1726_p13 = pneg %p1725_p11  ;;  %p1732_p7 = por %p1731_p5, %p1730_p6 }
  0x85   : > { %p1733_p10 = pnand %p1732_p7, %p1726_p13 }
  0x87   : > { %1736 = shalt.err (!%p1733_p10)
}
  0x88   : > { %s1737_s28 = scalar_lea.vmem %s473_s30, 16  ;;  %s2108_s20 = smov [#allocation11]  }
  0x89   : > { %p1738_p8 = scmp.ne.s32.totalorder %s473_s30, %s1737_s28  ;;  %s1742_s3 = sshll.u32 %s2108_s20, 4  ;;  %s1743_s3 = int_to_ptr.vmem [resolvable:$false] %s1742_s3 }
  0x8a   : > { %s1744_s1 = scalar_lea.vmem %s1743_s3, 32  ;;  %p1745_p1 = scmp.lt.s32.totalorder %s473_s30, %s1743_s3 }
  0x8b   : > { %p1740_p0 = pnand %p1738_p8, %p2405_p4  ;;  %p1746_p11 = scmp.lt.s32.totalorder %s1744_s1, %s1737_s28 }
  0x8d   : > { %p1741_p12 = pneg %p1740_p0  ;;  %p1747_p3 = por %p1746_p11, %p1745_p1 }
  0x8f   : > { %p1748_p2 = pnand %p1747_p3, %p1741_p12 }
  0x91   : > { %1751 = shalt.err (!%p1748_p2)
}
  0x92   : > { %p2934_p9 = scmp.ne.s32.totalorder %s2926_s21, 0  ;;  %s2935_s27 = scalar_lea.sflag [#allocation12], %s2330_s16 }
  0x93   : > { %s2936_s11 = sshll.u32 %s2320_s8, 6  ;;  %s372_s26 = scalar_lea.vmem [#allocation2], %s2316_s29 }
  0x94   : > { %1548 = dma.hbm_to_vmem [thread:$0]  (!%p2934_p9), %s2434_s9, 16, %s473_s30, %s2935_s27  }
  0x95   : > { %s2462_s3 = scalar_lea.hbm %s2851_s0, %s2936_s11  ;;  %s381_s28 = sshll.u32 %s372_s26, 4  ;;  %s382_s28 = int_to_ptr.vmem [resolvable:$true] %s381_s28 }
  0x96   : > { %s2466_s20 = sshll.u32 %s2379_s10, 1  ;;  %s2937_s1 = sand.u32 1, %s2084_s18  }
  0x97   : > { %s369_s5 = scalar_lea.sflag [#allocation3], %s2937_s1  ;;  %s1752_s14 = scalar_lea.hbm %s2462_s3, 64 }
  0x98   : > { %p1753_p3 = scmp.ne.s32.totalorder %s2462_s3, %s1752_s14  ;;  %p2938_p13 = scmp.ne.s32.totalorder %s2924_s13, 0 }
  0x99   : > { %s1757_s30 = scalar_lea.hbm %s2851_s0, 256  ;;  %p1758_p10 = scmp.lt.u32.totalorder %s2462_s3, %s2851_s0 }
  0x9a   : > { %p2939_p6 = pneg %p2938_p13  ;;  %p1759_p8 = scmp.lt.u32.totalorder %s1757_s30, %s1752_s14 }
  0x9b   : > { %p1761_p12 = scmp.lt.u32.totalorder %s1752_s14, %s2462_s3 }
  0x9c   : > { %p1755_p5 = pnand %p1753_p3, %p2939_p6  ;;  %p1760_p0 = por %p1759_p8, %p1758_p10 }
  0x9e   : > { %p1756_p7 = pneg %p1755_p5  ;;  %p1762_p1 = por %p1761_p12, %p1760_p0 }
  0xa0   : > { %p1763_p11 = pnand %p1762_p1, %p1756_p7 }
  0xa2   : > { %1766 = shalt.err (!%p1763_p11)
}
  0xa3   : > { %s1767_s29 = scalar_lea.vmem %s382_s28, 64  ;;  %p2940_p3 = pmov %p2939_p6 }
  0xa4   : > { %p1768_p2 = scmp.ne.s32.totalorder %s382_s28, %s1767_s29  ;;  %s2109_s15 = smov [#allocation2]  }
  0xa5   : > { %s1772_s25 = sshll.u32 %s2109_s15, 4  ;;  %s1773_s25 = int_to_ptr.vmem [resolvable:$false] %s1772_s25 }
  0xa6   : > { %p1770_p6 = pnand %p1768_p2, %p2940_p3  ;;  %s1774_s26 = scalar_lea.vmem %s1773_s25, 128 }
  0xa7   : > { %p1775_p9 = scmp.lt.s32.totalorder %s382_s28, %s1773_s25  ;;  %p1776_p4 = scmp.lt.s32.totalorder %s1774_s26, %s1767_s29 }
  0xa8   : > { %p1771_p5 = pneg %p1770_p6 }
  0xa9   : > { %p1777_p8 = por %p1776_p4, %p1775_p9 }
  0xab   : > { %p1778_p10 = pnand %p1777_p8, %p1771_p5 }
  0xad   : > { %1781 = shalt.err (!%p1778_p10)
}
  0xae   : > { %1533 = dma.hbm_to_vmem [thread:$0]  (!%p2938_p13), %s2462_s3, 64, %s382_s28, %s369_s5  }
  0xaf   : > { %s2490_s14 = sshll.u32 %s2100_s22, 5  ;;  %s412_s1 = scalar_lea.vmem [#allocation7], %s2466_s20 }
  0xb0   : > { %s419_s8 = sshll.u32 %s412_s1, 4  ;;  %s417_s27 = scalar_lea.hbm %s2853_s2, %s2490_s14  ;;  %s420_s8 = int_to_ptr.vmem [resolvable:$true] %s419_s8 }
  0xb1   : > { %s1782_s11 = scalar_lea.hbm %s417_s27, 32  ;;  %p2941_p9 = scmp.ne.s32.totalorder %s2931_s23, 0 }
  0xb2   : > { %p1783_p4 = scmp.ne.s32.totalorder %s417_s27, %s1782_s11  ;;  %s1787_s15 = scalar_lea.hbm %s2853_s2, 64 }
  0xb3   : > { %p1788_p13 = scmp.lt.u32.totalorder %s417_s27, %s2853_s2  ;;  %p1789_p12 = scmp.lt.u32.totalorder %s1787_s15, %s1782_s11 }
  0xb4   : > { %p1785_p7 = pnand %p1783_p4, %p2941_p9  ;;  %p1791_p11 = scmp.lt.u32.totalorder %s1782_s11, %s417_s27 }
  0xb5   : > { %p1790_p1 = por %p1789_p12, %p1788_p13 }
  0xb6   : > { %p1786_p0 = pneg %p1785_p7 }
  0xb7   : > { %p1792_p2 = por %p1791_p11, %p1790_p1 }
  0xb9   : > { %p1793_p3 = pnand %p1792_p2, %p1786_p0 }
  0xbb   : > { %1796 = shalt.err (!%p1793_p3)
}
  0xbc   : > { %s1797_s28 = scalar_lea.vmem %s420_s8, 32  ;;  %s2110_s25 = smov [#allocation7]  }
  0xbd   : > { %p1798_p6 = scmp.ne.s32.totalorder %s420_s8, %s1797_s28  ;;  %s1802_s26 = sshll.u32 %s2110_s25, 4  ;;  %s1803_s26 = int_to_ptr.vmem [resolvable:$false] %s1802_s26 }
  0xbe   : > { %s1804_s1 = scalar_lea.vmem %s1803_s26, 64  ;;  %p1805_p10 = scmp.lt.s32.totalorder %s420_s8, %s1803_s26 }
  0xbf   : > { %p1800_p5 = pnand %p1798_p6, %p2941_p9  ;;  %p1806_p4 = scmp.lt.s32.totalorder %s1804_s1, %s1797_s28 }
  0xc1   : > { %p1801_p8 = pneg %p1800_p5  ;;  %p1807_p7 = por %p1806_p4, %p1805_p10 }
  0xc3   : > { %p1808_p12 = pnand %p1807_p7, %p1801_p8 }
  0xc5   : > { %1811 = shalt.err (!%p1808_p12)
}
  0xc6   : > { %p2942_p13 = scmp.ne.s32.totalorder %s2926_s21, 0  ;;  %s2943_s9 = scalar_lea.sflag [#allocation6], %s2330_s16 }
  0xc7   : > { %s2515_s13 = scalar_lea.hbm %s2855_s4, %s2490_s14  ;;  %s448_s29 = scalar_lea.vmem [#allocation10], %s2466_s20 }
  0xc8   : > { %1539 = dma.hbm_to_vmem [thread:$0]  (!%p2942_p13), %s417_s27, 32, %s420_s8, %s2943_s9  }
  0xc9   : > { %s455_s15 = sshll.u32 %s448_s29, 4  ;;  %s2522_s28 = scalar_lea.hbm %s2857_s6, %s2490_s14  ;;  %s456_s15 = int_to_ptr.vmem [resolvable:$true] %s455_s15 }
  0xca   : > { %s1812_s25 = scalar_lea.hbm %s2515_s13, 32  ;;  %s1817_s26 = scalar_lea.hbm %s2855_s4, 64 }
  0xcb   : > { %p1813_p0 = scmp.ne.s32.totalorder %s2515_s13, %s1812_s25  ;;  %p1818_p2 = scmp.lt.u32.totalorder %s2515_s13, %s2855_s4 }
  0xcc   : > { %p1819_p3 = scmp.lt.u32.totalorder %s1817_s26, %s1812_s25  ;;  %p1821_p5 = scmp.lt.u32.totalorder %s1812_s25, %s2515_s13 }
  0xcd   : > { %p1815_p1 = pnand %p1813_p0, %p2941_p9 }
  0xce   : > { %p1820_p6 = por %p1819_p3, %p1818_p2 }
  0xcf   : > { %p1816_p11 = pneg %p1815_p1 }
  0xd0   : > { %p1822_p8 = por %p1821_p5, %p1820_p6 }
  0xd2   : > { %p1823_p10 = pnand %p1822_p8, %p1816_p11 }
  0xd4   : > { %1826 = shalt.err (!%p1823_p10)
}
  0xd5   : > { %s1827_s14 = scalar_lea.vmem %s456_s15, 32  ;;  %s2111_s30 = smov [#allocation10]  }
  0xd6   : > { %p1828_p4 = scmp.ne.s32.totalorder %s456_s15, %s1827_s14  ;;  %s1832_s11 = sshll.u32 %s2111_s30, 4  ;;  %s1833_s11 = int_to_ptr.vmem [resolvable:$false] %s1832_s11 }
  0xd7   : > { %s1834_s29 = scalar_lea.vmem %s1833_s11, 64  ;;  %p1835_p0 = scmp.lt.s32.totalorder %s456_s15, %s1833_s11 }
  0xd8   : > { %p1830_p7 = pnand %p1828_p4, %p2941_p9  ;;  %p1836_p1 = scmp.lt.s32.totalorder %s1834_s29, %s1827_s14 }
  0xda   : > { %p1831_p12 = pneg %p1830_p7  ;;  %p1837_p13 = por %p1836_p1, %p1835_p0 }
  0xdc   : > { %p1838_p2 = pnand %p1837_p13, %p1831_p12 }
  0xde   : > { %1841 = shalt.err (!%p1838_p2)
}
  0xdf   : > { %p2944_p3 = scmp.ne.s32.totalorder %s2926_s21, 0  ;;  %s2945_s5 = scalar_lea.sflag [#allocation9], %s2330_s16 }
  0xe0   : > { %s483_s3 = scalar_lea.vmem [#allocation13], %s2466_s20  ;;  %s1842_s8 = scalar_lea.hbm %s2522_s28, 32 }
  0xe1   : > { %1545 = dma.hbm_to_vmem [thread:$0]  (!%p2944_p3), %s2515_s13, 32, %s456_s15, %s2945_s5  }
  0xe2   : > { %s490_s25 = sshll.u32 %s483_s3, 4  ;;  %p1843_p11 = scmp.ne.s32.totalorder %s2522_s28, %s1842_s8  ;;  %s491_s25 = int_to_ptr.vmem [resolvable:$true] %s490_s25 }
  0xe3   : > { %s1847_s1 = scalar_lea.hbm %s2857_s6, 64  ;;  %p1848_p5 = scmp.lt.u32.totalorder %s2522_s28, %s2857_s6 }
  0xe4   : > { %p1845_p13 = pnand %p1843_p11, %p2941_p9  ;;  %p1849_p8 = scmp.lt.u32.totalorder %s1847_s1, %s1842_s8 }
  0xe5   : > { %p1851_p4 = scmp.lt.u32.totalorder %s1842_s8, %s2522_s28 }
  0xe6   : > { %p1846_p6 = pneg %p1845_p13  ;;  %p1850_p10 = por %p1849_p8, %p1848_p5 }
  0xe8   : > { %p1852_p7 = por %p1851_p4, %p1850_p10 }
  0xea   : > { %p1853_p12 = pnand %p1852_p7, %p1846_p6 }
  0xec   : > { %1856 = shalt.err (!%p1853_p12)
}
  0xed   : > { %s1857_s20 = scalar_lea.vmem %s491_s25, 32  ;;  %s2112_s13 = smov [#allocation13]  }
  0xee   : > { %p1858_p0 = scmp.ne.s32.totalorder %s491_s25, %s1857_s20  ;;  %s1862_s15 = sshll.u32 %s2112_s13, 4  ;;  %s1863_s15 = int_to_ptr.vmem [resolvable:$false] %s1862_s15 }
  0xef   : > { %s1864_s30 = scalar_lea.vmem %s1863_s15, 64  ;;  %p1865_p11 = scmp.lt.s32.totalorder %s491_s25, %s1863_s15 }
  0xf0   : > { %p1860_p1 = pnand %p1858_p0, %p2941_p9  ;;  %p1866_p13 = scmp.lt.s32.totalorder %s1864_s30, %s1857_s20 }
  0xf2   : > { %p1861_p2 = pneg %p1860_p1  ;;  %p1867_p3 = por %p1866_p13, %p1865_p11 }
  0xf4   : > { %p1868_p5 = pnand %p1867_p3, %p1861_p2 }
  0xf6   : > { %1871 = shalt.err (!%p1868_p5)
}
  0xf7   : > { %p2946_p8 = scmp.ne.s32.totalorder %s2926_s21, 0  ;;  %s2947_s11 = scalar_lea.sflag [#allocation12], %s2330_s16 }
  0xf8   : > { %s2948_s29 = sshll.u32 %s2100_s22, 6  ;;  %s2949_s27 = sshll.u32 %s2379_s10, 2 }
  0xf9   : > { %1551 = dma.hbm_to_vmem [thread:$0]  (!%p2946_p8), %s2522_s28, 32, %s491_s25, %s2947_s11  }
  0xfa   : > { %s2568_s8 = scalar_lea.hbm %s2858_s7, %s2948_s29  ;;  %s501_s26 = scalar_lea.vmem [#allocation14], %s2949_s27 }
  0xfb   : > { %s508_s1 = sshll.u32 %s501_s26, 4  ;;  %s498_s16 = scalar_lea.sflag [#allocation15], %s2379_s10  ;;  %s509_s1 = int_to_ptr.vmem [resolvable:$true] %s508_s1 }
  0xfc   : > { %s1872_s9 = scalar_lea.hbm %s2568_s8, 64  ;;  %s1877_s14 = scalar_lea.hbm %s2858_s7, 128 }
  0xfd   : > { %p1873_p3 = scmp.ne.s32.totalorder %s2568_s8, %s1872_s9  ;;  %p1878_p4 = scmp.lt.u32.totalorder %s2568_s8, %s2858_s7 }
  0xfe   : > { %p1879_p7 = scmp.lt.u32.totalorder %s1877_s14, %s1872_s9  ;;  %p1881_p0 = scmp.lt.u32.totalorder %s1872_s9, %s2568_s8 }
  0xff   : > { %p1875_p6 = pnand %p1873_p3, %p2941_p9 }
 0x100   : > { %p1880_p12 = por %p1879_p7, %p1878_p4 }
 0x101   : > { %p1876_p10 = pneg %p1875_p6 }
 0x102   : > { %p1882_p1 = por %p1881_p0, %p1880_p12 }
 0x104   : > { %p1883_p2 = pnand %p1882_p1, %p1876_p10 }
 0x106   : > { %1886 = shalt.err (!%p1883_p2)
}
 0x107   : > { %s1887_s10 = scalar_lea.vmem %s509_s1, 64  ;;  %s2113_s15 = smov [#allocation14]  }
 0x108   : > { %p1888_p11 = scmp.ne.s32.totalorder %s509_s1, %s1887_s10  ;;  %s1892_s30 = sshll.u32 %s2113_s15, 4  ;;  %s1893_s30 = int_to_ptr.vmem [resolvable:$false] %s1892_s30 }
 0x109   : > { %s1894_s11 = scalar_lea.vmem %s1893_s30, 128  ;;  %p1895_p3 = scmp.lt.s32.totalorder %s509_s1, %s1893_s30 }
 0x10a   : > { %p1890_p13 = pnand %p1888_p11, %p2941_p9  ;;  %p1896_p6 = scmp.lt.s32.totalorder %s1894_s11, %s1887_s10 }
 0x10c   : > { %p1891_p5 = pneg %p1890_p13  ;;  %p1897_p8 = por %p1896_p6, %p1895_p3 }
 0x10e   : > { %p1898_p4 = pnand %p1897_p8, %p1891_p5 }
 0x110   : > { %1901 = shalt.err (!%p1898_p4)
}
 0x111   : > { %p2950_p7 = scmp.ne.s32.totalorder %s2926_s21, 0  ;;  %p2951_p10 = scmp.ne.s32.totalorder %s2929_s19, 0 }
 0x112   : > { %s2593_s23 = sand.u32 (!%p2951_p10), 1, %s2080_s17   ;;  %p2952_p9 = scmp.ne.s32.totalorder (!%p2951_p10), %s2912_s12, 0 }
 0x113   : > { %1554 = dma.hbm_to_vmem [thread:$0]  (!%p2950_p7), %s2568_s8, 64, %s509_s1, %s498_s16  }
 0x114   : > { %517 = sbr.rel (%p2951_p10) target bundleno = 696 (0x2b8), region = 52  ;;  %s1396_s29 = sshll.u32 (!%p2951_p10), %s2593_s23, 2 }
 0x115   : > { %s520_s5 = scalar_lea.sflag (!%p2951_p10), [#allocation3], %s2593_s23  ;;  %s2597_s3 = scalar_lea.vmem (!%p2951_p10), [#allocation2], %s1396_s29 }
 0x11b   : > { %2031 = dma.done.wait (%p2952_p9), %s520_s5, 64  }
 0x11c   : > { %2033 = vsyncadd (%p2952_p9), %s520_s5, 4294967232  ;;  %s2604_s21 = sand.u32 1, %s2233_s24   ;;  %s532_s8 = scalar_lea.vmem [#allocation5], %s1396_s29 }
 0x11d   : > { %s529_s19 = scalar_lea.sflag [#allocation6], %s2604_s21 }
 0x11e   : > { %2035 = dma.done.wait (%p2952_p9), %s529_s19, 64  }
 0x11f   : > { %2037 = vsyncadd (%p2952_p9), %s529_s19, 4294967232  ;;  %s2953_s27 = sld [smem:[#allocation28_spill]]  ;;  %s2954_s26 = sld [smem:[#allocation39_spill]] }
 0x125   : > { %s2612_s1 = sand.u32 1, %s2953_s27   ;;  %p2955_p8 = scmp.ne.s32.totalorder %s2954_s26, 0 }
 0x126   : > { %s2615_s16 = sshll.u32 %s2612_s1, 1 }
 0x127   : > { %s541_s9 = scalar_lea.vmem [#allocation7], %s2615_s16 }
 0x128   : > { %2039 = dma.done.wait (%p2955_p8), %s529_s19, 32  }
 0x129   : > { %2041 = vsyncadd (%p2955_p8), %s529_s19, 4294967264  ;;  %s1399_s24 = sshll.u32 %s2612_s1, 2  ;;  %s547_s12 = scalar_lea.sflag [#allocation9], %s2604_s21 }
 0x12a   : > { %s2624_s28 = scalar_lea.vmem [#allocation8], %s1399_s24 }
 0x12b   : > { %2043 = dma.done.wait (%p2955_p8), %s547_s12, 96  }
 0x12c   : > { %2045 = vsyncadd (%p2955_p8), %s547_s12, 4294967200  ;;  %s559_s25 = scalar_lea.vmem [#allocation10], %s2615_s16  ;;  %s565_s14 = scalar_lea.sflag [#allocation12], %s2604_s21 }
 0x12d   : > { %s567_s20 = scalar_lea.vmem [#allocation11], %s2612_s1 }
 0x12e   : > { %2047 = dma.done.wait (%p2955_p8), %s565_s14, 48  }
 0x12f   : > { %2049 = vsyncadd (%p2955_p8), %s565_s14, 4294967248  ;;  %s576_s13 = scalar_lea.vmem [#allocation13], %s2615_s16  ;;  %s582_s10 = scalar_lea.sflag [#allocation15], %s2612_s1 }
 0x130   : > { %s585_s15 = scalar_lea.vmem [#allocation14], %s1399_s24 }
 0x131   : > { %2051 = dma.done.wait (%p2955_p8), %s582_s10, 64  }
 0x132   : > { %2053 = vsyncadd (%p2955_p8), %s582_s10, 4294967232  ;;  %v2114_v0 = vmov 0.0   ;;  %vm2115_vm0 = vmmov 0   ;;  %v670_v1 = vld [vmem:[%s532_s8] sm:$0xf]  ;;  %vm683_vm1 = vcmask 1041408  }
 0x133   : > { %1474 = vmatprep.subr.bf16.mxu0 %v2114_v0  ;;  %1476 = vmatprep.mubr.msk.bf16.mxu0 %vm2115_vm0, %v2114_v0  ;;  %v668_v2 = vld [vmem:[%s2597_s3] sm:$0xf]  ;;  %v671_v3 = vpack.c.bf16 %v670_v1, %v670_v1  ;;  %v780_v5 = vld [vmem:[%s559_s25] sm:$0x3]  ;;  %v672_v8 = vld [vmem:[%s541_s9] sm:$0x3] }
 0x134   : > { %1480 = vmatprep.subr.bf16.mxu1 %v2114_v0  ;;  %1482 = vmatprep.mubr.msk.bf16.mxu1 %vm2115_vm0, %v2114_v0  ;;  %v669_v4 = vpack.c.bf16 %v668_v2, %v668_v2  ;;  %vm679_vm2 = vcmask 31744   ;;  %v727_v9 = vld [vmem:[%s576_s13] sm:$0x3]  ;;  %v829_v10 = vsel %vm683_vm1, %v780_v5, 0  ;;  %v728_v11 = vld [vmem:[%s585_s15] sm:$0xf] }
 0x135   : > { %788 = vxpose.xlu0.c.b16.start.end [1/1] (short) %v671_v3, 128  ;;  %v738_v7 = vsel %vm683_vm1, %v671_v3, 0  ;;  %v2116_v12 = vmov 0   ;;  %v673_v13 = vld [vmem:[%s2624_s28] sm:$0xf]  ;;  %s1403_s30 = sshll.u32 %s2593_s23, 1  ;;  %s2956_s11 = sld [smem:[#allocation32_spill]] }
 0x136   : > { %v685_v6 = vsel %vm683_vm1, %v669_v4, 0  ;;  %1481 = vmatpush3.bf16.msra.mxu1 %v738_v7  ;;  %1661 = vset.pattern.permute.xlu1 %v2116_v12  ;;  %s2957_s29 = sld [smem:[#allocation31_spill]]  ;;  %s2958_s5 = sld [smem:[#allocation40_spill]] }
 0x137   : > { %1475 = vmatpush3.bf16.msra.mxu0 %v685_v6  ;;  %1507 = vmatprep.subr.msk.bf16.mxu1 %vm683_vm1, %v780_v5  ;;  %s2658_s3 = scalar_lea.vmem [#allocation19], %s1403_s30  ;;  %s651_s19 = scalar_lea.vmem [#allocation16], %s1403_s30 }
 0x138   : > { %1506 = vmatprep.subr.msk.bf16.mxu0 %vm683_vm1, %v780_v5  ;;  %731 = vperm.xlu1 %1661, %v728_v11   ;;  %s1039_s26 = sshll.u32 %s651_s19, 4  ;;  %s2959_s12 = sld [smem:[#allocation45_spill]]  ;;  %s2666_s26 = int_to_ptr.vmem [resolvable:$true] %s1039_s26 }
 0x139   : > { %1483 = vmatmul.mubr.msk.bf16.vlgmr.msra.gmra.mrb[0].mxu1 %vm679_vm2, %v727_v9  ;;  %s1014_s25 = scalar_lea.sflag [#allocation4], %s2593_s23  ;;  %s1902_s14 = scalar_lea.vmem %s2666_s26, 32 }
 0x13a   : > { %1477 = vmatmul.mubr.msk.bf16.vlgmr.msra.gmra.mrb[0].mxu0 %vm679_vm2, %v672_v8  ;;  %1505 = vmatpush3.bf16.msra.mxu1 %v829_v10  ;;  %p1903_p12 = scmp.ne.s32.totalorder %s2666_s26, %s1902_s14  ;;  %s2117_s13 = smov [#allocation16]  }
 0x13b   : > { %1487 = vmatpush3.bf16.msra.mxu0 %v829_v10  ;;  %s1436_s8 = sshll.u32 %s2956_s11, 1  ;;  %s1906_s10 = sshll.u32 %s2117_s13, 4  ;;  %s1907_s10 = int_to_ptr.vmem [resolvable:$false] %s1906_s10 }
 0x13c   : > { %s2663_s27 = sadd.s32 %s2957_s29, %s1436_s8  ;;  %p2960_p0 = scmp.ne.s32.totalorder %s2958_s5, 0 }
 0x13d   : > { %s2895_s16 = sshll.u32 %s2663_s27, 5  ;;  %s1908_s15 = scalar_lea.vmem %s1907_s10, 64 }
 0x13e   : > { %1660 = vset.pattern.permute.xlu0 %v2116_v12  ;;  %s1037_s28 = scalar_lea.hbm %s2959_s12, %s2895_s16  ;;  %p1904_p1 = pnand %p1903_p12, %p2960_p0 }
 0x13f   : > { %p1909_p11 = scmp.lt.s32.totalorder %s2666_s26, %s1907_s10  ;;  %p1910_p13 = scmp.lt.s32.totalorder %s1908_s15, %s1902_s14 }
 0x140   : > { %p1905_p2 = pneg %p1904_p1 }
 0x141   : > { %p1911_p5 = por %p1910_p13, %p1909_p11 }
 0x143   : > { %p1912_p3 = pnand %p1911_p5, %p1905_p2 }
 0x15a   : > { %676 = vperm.xlu0 %1660, %v673_v13  }
 0x19b   : > { %v796_v14 = vpop.trf.xlu0 }
 0x19c   : > { %1488 = vmatprep.mubr.msk.bf16.mxu0 %vm679_vm2, %v796_v14 }
 0x19f   : > { %v797_v15 = vpop.trf.xlu0 }
 0x1a0   : > { %1489 = vmatmul.mubr.msk.bf16.vlgmr.msra.gmra.mrb[4].mxu0 %vm679_vm2, %v797_v15 }
 0x1a3   : > { %v798_v16 = vpop.trf.xlu0 }
 0x1a4   : > { %1492 = vmatprep.mubr.msk.bf16.mxu0 %vm679_vm2, %v798_v16 }
 0x1a7   : > { %v799_v17 = vpop.trf.xlu0 }
 0x1a8   : > { %1493 = vmatmul.mubr.msk.bf16.gmra.mrb[8].mxu0 %vm679_vm2, %v799_v17 }
 0x1ab   : > { %v800_v18 = vpop.trf.xlu0 }
 0x1ac   : > { %1496 = vmatprep.mubr.msk.bf16.mxu1 %vm679_vm2, %v800_v18 }
 0x1af   : > { %v801_v19 = vpop.trf.xlu0 }
 0x1b0   : > { %1497 = vmatmul.mubr.msk.bf16.vlgmr.msra.gmra.mrb[4].mxu1 %vm679_vm2, %v801_v19 }
 0x1b3   : > { %v802_v20 = vpop.trf.xlu0 }
 0x1b4   : > { %1500 = vmatprep.mubr.msk.bf16.mxu1 %vm679_vm2, %v802_v20 }
 0x1b7   : > { %v803_v21 = vpop.trf.xlu0  ;;  %v732_v22 = vpop.permute.xlu1 %731 }
 0x1b8   : > { %1501 = vmatmul.mubr.msk.bf16.gmra.mrb[8].mxu1 %vm679_vm2, %v803_v21 }
 0x1d9   : > { %v677_v23 = vpop.permute.xlu0 %676 }
 0x20c   : > { %v774_v25 = vpop.f32.mrb[0].mxu1 }
 0x20d   : > { %v721_v24 = vpop.f32.mrb[0].mxu0  ;;  %v1484_v27 = vpop.f32.mrb[1].mxu1  ;;  %v775_v28 = vadd.f32 %v774_v25, %v732_v22 }
 0x20e   : > { %v1478_v26 = vpop.f32.mrb[1].mxu0  ;;  %v722_v29 = vadd.f32 %v721_v24, %v677_v23  ;;  %v777_v31 = vpop.f32.mrb[2].mxu1 }
 0x20f   : > { %v724_v30 = vpop.f32.mrb[2].mxu0  ;;  %v930_v33 = vpack.c.bf16 %v775_v28, %v775_v28  ;;  %v1485_v35 = vpop.f32.mrb[3].mxu1 }
 0x210   : > { %v1479_v32 = vpop.f32.mrb[3].mxu0  ;;  %v928_v34 = vpack.c.bf16 %v722_v29, %v722_v29 }
 0x211   : > { %931 = vst [vmem:[%s2658_s3] sm:$0x3] %v930_v33 }
 0x212   : > { %929 = vst [vmem:[%s651_s19] sm:$0x3] %v928_v34 }
 0x213   : > { %1915 = shalt.err (!%p1912_p3)
}
 0x214   : > { %s1916_s30 = scalar_lea.hbm %s1037_s28, 32  ;;  %s1920_s9 = scalar_lea.hbm %s2959_s12, 128 }
 0x215   : > { %p1917_p6 = scmp.ne.s32.totalorder %s1037_s28, %s1916_s30  ;;  %p1921_p10 = scmp.lt.u32.totalorder %s1037_s28, %s2959_s12 }
 0x216   : > { %p1922_p9 = scmp.lt.u32.totalorder %s1920_s9, %s1916_s30  ;;  %p1924_p12 = scmp.lt.u32.totalorder %s1916_s30, %s1037_s28 }
 0x217   : > { %p1918_p4 = pnand %p1917_p6, %p2960_p0 }
 0x218   : > { %p1923_p8 = por %p1922_p9, %p1921_p10 }
 0x219   : > { %p1919_p7 = pneg %p1918_p4 }
 0x21a   : > { %p1925_p1 = por %p1924_p12, %p1923_p8 }
 0x21c   : > { %p1926_p2 = pnand %p1925_p1, %p1919_p7 }
 0x21e   : > { %1929 = shalt.err (!%p1926_p2)
}
 0x21f   : > { %1524 = dma.vmem_to_hbm [thread:$0]  (%p2960_p0), %s2666_s26, 32, %s1037_s28, %s1014_s25   ;;  %v2692_v36 = vld [vmem:[%s567_s20] ss:$0 sm:$0xff]  ;;  %vm996_vm3 = vcmask 27648  }
 0x220   : > { %s1404_s14 = sshll.u32 %s2593_s23, 6  ;;  %s1438_s23 = sshll.u32 %s2957_s29, 4 }
 0x221   : > { %s2699_s26 = scalar_lea.vmem [#allocation17], %s1404_s14  ;;  %s1439_s1 = sshll.u32 %s2956_s11, 5 }
 0x222   : > { %s1051_s20 = sadd.s32 %s1439_s1, %s1438_s23  ;;  %s1054_s29 = sshll.u32 %s2699_s26, 4  ;;  %s2748_s29 = int_to_ptr.vmem [resolvable:$true] %s1054_s29 }
 0x223   : > { %s1440_s11 = sshll.u32 %s1051_s20, 6  ;;  %s1072_s16 = sshll.u32 %s2658_s3, 4  ;;  %s2761_s16 = int_to_ptr.vmem [resolvable:$true] %s1072_s16 }
 0x224   : > { %s2961_s13 = sld [smem:[#allocation46_spill]]  ;;  %s2963_s30 = sshll.u32 %s2663_s27, 5 }
 0x225   : > { %s2964_s8 = sld [smem:[#allocation47_spill]]  ;;  %s1019_s24 = scalar_lea.sflag [#allocation18], %s2604_s21 }
 0x226   : > { %s1930_s14 = scalar_lea.vmem %s2748_s29, 1024  ;;  %s2118_s23 = smov [#allocation17]  }
 0x227   : > { %p1931_p11 = scmp.ne.s32.totalorder %s2748_s29, %s1930_s14  ;;  %s1934_s1 = sshll.u32 %s2118_s23, 4  ;;  %s1935_s1 = int_to_ptr.vmem [resolvable:$false] %s1934_s1 }
 0x228   : > { %s1936_s20 = scalar_lea.vmem %s1935_s1, 2048  ;;  %p1937_p3 = scmp.lt.s32.totalorder %s2748_s29, %s1935_s1 }
 0x229   : > { %p1932_p13 = pnand %p1931_p11, %p2960_p0  ;;  %p1938_p6 = scmp.lt.s32.totalorder %s1936_s20, %s1930_s14 }
 0x22a   : > { %s2962_s10 = smov %s2961_s13  ;;  %s2746_s15 = scalar_lea.hbm %s2961_s13, %s1440_s11 }
 0x22b   : > { %s2759_s9 = scalar_lea.hbm %s2964_s8, %s2963_s30  ;;  %p1933_p5 = pneg %p1932_p13 }
 0x22c   : > { %p1939_p4 = por %p1938_p6, %p1937_p3 }
 0x22e   : > { %p1940_p7 = pnand %p1939_p4, %p1933_p5 }
 0x273   : > { %v1490_v37 = vpop.f32.mrb[4].mxu0 }
 0x274   : > { %v874_v38 = vadd.f32 %v1490_v37, %v2692_v36  ;;  %v865_v39 = vpop.f32.mrb[5].mxu0 }
 0x275   : > { %v866_v40 = vadd.f32 %v2692_v36, %v865_v39  ;;  %v1491_v41 = vpop.f32.mrb[6].mxu0 }
 0x276   : > { %v1447_v42 = vpack.c.bf16 %v874_v38, %v874_v38  ;;  %v877_v43 = vadd.f32 %v1491_v41, %v2692_v36  ;;  %v868_v44 = vpop.f32.mrb[7].mxu0 }
 0x277   : > { %v1445_v45 = vpack.c.bf16 %v866_v40, %v866_v40  ;;  %v869_v46 = vadd.f32 %v2692_v36, %v868_v44 }
 0x278   : > { %999 = vst.msk [vmem:[%s2699_s26 + $0x8] sm:$0xf] %vm996_vm3, %v1447_v42  ;;  %v1448_v47 = vpack.c.bf16 %v877_v43, %v877_v43 }
 0x279   : > { %997 = vst.msk [vmem:[%s2699_s26] sm:$0xf] %vm996_vm3, %v1445_v45  ;;  %v1446_v48 = vpack.c.bf16 %v869_v46, %v869_v46 }
 0x27a   : > { %1000 = vst.msk [vmem:[%s2699_s26 + $0xc] sm:$0xf] %vm996_vm3, %v1448_v47 }
 0x27b   : > { %998 = vst.msk [vmem:[%s2699_s26 + $0x4] sm:$0xf] %vm996_vm3, %v1446_v48  ;;  %v1494_v49 = vpop.f32.mrb[8].mxu0 }
 0x27c   : > { %v890_v50 = vadd.f32 %v1494_v49, %v2692_v36  ;;  %v881_v51 = vpop.f32.mrb[9].mxu0 }
 0x27d   : > { %v882_v52 = vadd.f32 %v2692_v36, %v881_v51  ;;  %v1495_v53 = vpop.f32.mrb[10].mxu0 }
 0x27e   : > { %v1451_v54 = vpack.c.bf16 %v890_v50, %v890_v50  ;;  %v893_v55 = vadd.f32 %v1495_v53, %v2692_v36  ;;  %v884_v56 = vpop.f32.mrb[11].mxu0 }
 0x27f   : > { %v1449_v57 = vpack.c.bf16 %v882_v52, %v882_v52  ;;  %v885_v58 = vadd.f32 %v2692_v36, %v884_v56 }
 0x280   : > { %1003 = vst.msk [vmem:[%s2699_s26 + $0x18] sm:$0xf] %vm996_vm3, %v1451_v54  ;;  %v1452_v59 = vpack.c.bf16 %v893_v55, %v893_v55 }
 0x281   : > { %1001 = vst.msk [vmem:[%s2699_s26 + $0x10] sm:$0xf] %vm996_vm3, %v1449_v57  ;;  %v1450_v60 = vpack.c.bf16 %v885_v58, %v885_v58 }
 0x282   : > { %1004 = vst.msk [vmem:[%s2699_s26 + $0x1c] sm:$0xf] %vm996_vm3, %v1452_v59 }
 0x283   : > { %1002 = vst.msk [vmem:[%s2699_s26 + $0x14] sm:$0xf] %vm996_vm3, %v1450_v60  ;;  %v1498_v61 = vpop.f32.mrb[4].mxu1 }
 0x284   : > { %v906_v62 = vadd.f32 %v1498_v61, %v2692_v36  ;;  %v897_v63 = vpop.f32.mrb[5].mxu1 }
 0x285   : > { %v898_v0 = vadd.f32 %v2692_v36, %v897_v63  ;;  %v1499_v1 = vpop.f32.mrb[6].mxu1 }
 0x286   : > { %v1455_v2 = vpack.c.bf16 %v906_v62, %v906_v62  ;;  %v909_v3 = vadd.f32 %v1499_v1, %v2692_v36  ;;  %v900_v4 = vpop.f32.mrb[7].mxu1 }
 0x287   : > { %v1453_v5 = vpack.c.bf16 %v898_v0, %v898_v0  ;;  %v901_v6 = vadd.f32 %v2692_v36, %v900_v4 }
 0x288   : > { %1007 = vst.msk [vmem:[%s2699_s26 + $0x28] sm:$0xf] %vm996_vm3, %v1455_v2  ;;  %v1456_v7 = vpack.c.bf16 %v909_v3, %v909_v3 }
 0x289   : > { %1005 = vst.msk [vmem:[%s2699_s26 + $0x20] sm:$0xf] %vm996_vm3, %v1453_v5  ;;  %v1454_v8 = vpack.c.bf16 %v901_v6, %v901_v6 }
 0x28a   : > { %1008 = vst.msk [vmem:[%s2699_s26 + $0x2c] sm:$0xf] %vm996_vm3, %v1456_v7 }
 0x28b   : > { %1006 = vst.msk [vmem:[%s2699_s26 + $0x24] sm:$0xf] %vm996_vm3, %v1454_v8  ;;  %v1502_v9 = vpop.f32.mrb[8].mxu1 }
 0x28c   : > { %v922_v10 = vadd.f32 %v1502_v9, %v2692_v36  ;;  %v913_v11 = vpop.f32.mrb[9].mxu1 }
 0x28d   : > { %v914_v12 = vadd.f32 %v2692_v36, %v913_v11  ;;  %v1503_v13 = vpop.f32.mrb[10].mxu1 }
 0x28e   : > { %v1459_v14 = vpack.c.bf16 %v922_v10, %v922_v10  ;;  %v925_v15 = vadd.f32 %v1503_v13, %v2692_v36  ;;  %v916_v16 = vpop.f32.mrb[11].mxu1 }
 0x28f   : > { %v1457_v17 = vpack.c.bf16 %v914_v12, %v914_v12  ;;  %v917_v18 = vadd.f32 %v2692_v36, %v916_v16 }
 0x290   : > { %1011 = vst.msk [vmem:[%s2699_s26 + $0x38] sm:$0xf] %vm996_vm3, %v1459_v14  ;;  %v1460_v19 = vpack.c.bf16 %v925_v15, %v925_v15 }
 0x291   : > { %1009 = vst.msk [vmem:[%s2699_s26 + $0x30] sm:$0xf] %vm996_vm3, %v1457_v17  ;;  %v1458_v20 = vpack.c.bf16 %v917_v18, %v917_v18 }
 0x292   : > { %1012 = vst.msk [vmem:[%s2699_s26 + $0x3c] sm:$0xf] %vm996_vm3, %v1460_v19 }
 0x293   : > { %1010 = vst.msk [vmem:[%s2699_s26 + $0x34] sm:$0xf] %vm996_vm3, %v1458_v20 }
 0x294   : > { %1943 = shalt.err (!%p1940_p7)
}
 0x295   : > { %s1944_s27 = scalar_lea.hbm %s2746_s15, 1024  ;;  %s1948_s28 = scalar_lea.hbm %s2962_s10, 4096 }
 0x296   : > { %p1945_p10 = scmp.ne.s32.totalorder %s2746_s15, %s1944_s27  ;;  %p1949_p12 = scmp.lt.u32.totalorder %s2746_s15, %s2962_s10 }
 0x297   : > { %p1950_p1 = scmp.lt.u32.totalorder %s1948_s28, %s1944_s27  ;;  %p1952_p11 = scmp.lt.u32.totalorder %s1944_s27, %s2746_s15 }
 0x298   : > { %p1946_p9 = pnand %p1945_p10, %p2960_p0 }
 0x299   : > { %p1951_p2 = por %p1950_p1, %p1949_p12 }
 0x29a   : > { %p1947_p8 = pneg %p1946_p9 }
 0x29b   : > { %p1953_p13 = por %p1952_p11, %p1951_p2 }
 0x29d   : > { %p1954_p5 = pnand %p1953_p13, %p1947_p8 }
 0x29f   : > { %1957 = shalt.err (!%p1954_p5)
}
 0x2a0   : > { %s2119_s30 = smov 64   ;;  %s2120_s3 = smov 4  }
 0x2a1   : > { %1525 = dma.vmem_to_hbm [thread:$0]  (%p2960_p0), %s2748_s29, 1024, %s2746_s15, %s1019_s24, %s2119_s30, %s2119_s30, %s2120_s3  }
 0x2a2   : > { %s1958_s19 = scalar_lea.vmem %s2761_s16, 32  ;;  %s2121_s14 = smov [#allocation19]  }
 0x2a3   : > { %p1959_p3 = scmp.ne.s32.totalorder %s2761_s16, %s1958_s19  ;;  %s1962_s23 = sshll.u32 %s2121_s14, 4  ;;  %s1963_s23 = int_to_ptr.vmem [resolvable:$false] %s1962_s23 }
 0x2a4   : > { %s1964_s1 = scalar_lea.vmem %s1963_s23, 64  ;;  %p1965_p7 = scmp.lt.s32.totalorder %s2761_s16, %s1963_s23 }
 0x2a5   : > { %p1960_p6 = pnand %p1959_p3, %p2960_p0  ;;  %p1966_p10 = scmp.lt.s32.totalorder %s1964_s1, %s1958_s19 }
 0x2a7   : > { %p1961_p4 = pneg %p1960_p6  ;;  %p1967_p9 = por %p1966_p10, %p1965_p7 }
 0x2a9   : > { %p1968_p8 = pnand %p1967_p9, %p1961_p4 }
 0x2ab   : > { %1971 = shalt.err (!%p1968_p8)
}
 0x2ac   : > { %s1972_s29 = scalar_lea.hbm %s2759_s9, 32  ;;  %s1976_s27 = scalar_lea.hbm %s2964_s8, 128 }
 0x2ad   : > { %p1973_p12 = scmp.ne.s32.totalorder %s2759_s9, %s1972_s29  ;;  %p1977_p11 = scmp.lt.u32.totalorder %s2759_s9, %s2964_s8 }
 0x2ae   : > { %p1978_p13 = scmp.lt.u32.totalorder %s1976_s27, %s1972_s29  ;;  %p1980_p3 = scmp.lt.u32.totalorder %s1972_s29, %s2759_s9 }
 0x2af   : > { %p1974_p1 = pnand %p1973_p12, %p2960_p0 }
 0x2b0   : > { %p1979_p5 = por %p1978_p13, %p1977_p11 }
 0x2b1   : > { %p1975_p2 = pneg %p1974_p1 }
 0x2b2   : > { %p1981_p6 = por %p1980_p3, %p1979_p5 }
 0x2b4   : > { %p1982_p4 = pnand %p1981_p6, %p1975_p2 }
 0x2b6   : > { %1985 = shalt.err (!%p1982_p4)
}
 0x2b7   : > { %1526 = dma.vmem_to_hbm [thread:$0]  (%p2960_p0), %s2761_s16, 32, %s2759_s9, %s1019_s24  }
 0x2b8 PF: > { %s2965_s28 = sld [smem:[#allocation34_spill]]  ;;  %s2966_s25 = sld [smem:[#allocation30_spill]] }
 0x2b9   : > { %s2967_s13 = sld [smem:[#allocation41_spill]] }
 0x2be   : > { %p1566_p7 = scmp.ge.s32.totalorder %s2965_s28, 2  ;;  %s1084_s30 = sand.u32 1, %s2966_s25  }
 0x2bf   : > { %p2968_p10 = scmp.ne.s32.totalorder %s2967_s13, 0  ;;  %s1085_s3 = scalar_lea.sflag [#allocation4], %s1084_s30 }
 0x2c1   : > { %p1556_p9 = pnand %p1566_p7, %p2968_p10 }
 0x2c3   : > { %2055 = dma.done.wait (!%p1556_p9), %s1085_s3, 32  }
 0x2c4   : > { %2057 = vsyncadd (!%p1556_p9), %s1085_s3, 4294967264  ;;  %s2969_s19 = sadd.s32 4294967294, %s2965_s28  }
 0x2c5   : > { %s1093_s14 = sand.u32 1, %s2969_s19  }
 0x2c6   : > { %s1094_s5 = scalar_lea.sflag [#allocation18], %s1093_s14 }
 0x2c7   : > { %2059 = dma.done.wait (!%p1556_p9), %s1094_s5, 1056  }
 0x2c8   : > { %2061 = vsyncadd (!%p1556_p9), %s1094_s5, 4294966240  ;;  %s42_s23 = sadd.s32 1, %s2965_s28   ;;  %s2970_s13 = sld [smem:[#allocation28_spill]] }
 0x2c9   : > { %p39_p0 = scmp.ge.s32.totalorder %s42_s23, 6   ;;  %s2971_s14 = sld [smem:[#allocation29_spill]] }
 0x2ca   : > { %s2972_s15 = sld [smem:[#allocation37_spill]]  ;;  %s2973_s21 = sld [smem:[#allocation38_spill]] }
 0x2cb   : > { %s2974_s19 = sld [smem:[#allocation33_spill]]  ;;  %s2975_s9 = sld [smem:[#allocation35_spill]] }
 0x2cc   : > { %s2976_s24 = sld [smem:[#allocation36_spill]]  ;;  %s2977_s16 = smov %s2080_s17 }
 0x2cd   : > { %s2978_s17 = smov %s2084_s18  ;;  %s2980_s20 = smov %s2100_s22 }
 0x2ce   :  { %41 = sbr.rel (!%p39_p0) target bundleno = 26 (0x1a), region = 214 }
 0x2d0   : > { %s2979_s18 = smov %s2973_s21 }
 0x2d1   : > { %s2981_s21 = smov %s2975_s9 }
 0x2d2   : > { %s2982_s22 = smov %s2976_s24 }
 0x2d5   :  { %1108 = vsyncpa [#allocation3], 1 }
 0x2d6   :  { %1110 = vsyncpa [#allocation3 + $0x1], 1 }
 0x2d7   :  { %1111 = vsyncpa [#allocation6], 1 }
 0x2d8   :  { %1113 = vsyncpa [#allocation6 + $0x1], 1 }
 0x2d9   :  { %1114 = vsyncpa [#allocation9], 1 }
 0x2da   :  { %1116 = vsyncpa [#allocation9 + $0x1], 1 }
 0x2db   :  { %1117 = vsyncpa [#allocation12], 1 }
 0x2dc   :  { %1119 = vsyncpa [#allocation12 + $0x1], 1 }
 0x2dd   :  { %1120 = vsyncpa [#allocation15], 1 }
 0x2de   :  { %1122 = vsyncpa [#allocation15 + $0x1], 1 }
 0x2df   :  { %1123 = vsyncpa [#allocation4], 1 }
 0x2e0   :  { %1125 = vsyncpa [#allocation4 + $0x1], 1 }
 0x2e1   :  { %1126 = vsyncpa [#allocation18], 1 }
 0x2e2   :  { %1128 = vsyncpa [#allocation18 + $0x1], 1 }

</bundles_post_ra>
